<compile_context>
chip_gen: v7x
topology: tpu7x:2x2x1
jax: 0.10.0
libtpu: 0.0.40
codegen_flags: <defaults>
</compile_context>

<pallas_src>
import numpy as np
import jax
import jax.numpy as jnp
from jax.experimental import pallas as pl
from jax.experimental.pallas import tpu as pltpu


# ----------------------------- model config ---------------------------------
BATCH = 8
INPUT_DIM = 64
HIDDEN_DIM = 64          # hidden//2=32, hidden//4=16, hidden//8=8
LATENT_DIM = 8
EPS = 1e-8
PAD = 128                # lane width: output (fan-out) axis padding
K_PAD = 64               # contraction (fan-in) axis padding (max real fan-in)

ENC_DIMS = [INPUT_DIM, HIDDEN_DIM, HIDDEN_DIM // 2, HIDDEN_DIM // 4,
            HIDDEN_DIM // 8, 2 * LATENT_DIM]
DEC_DIMS = [LATENT_DIM, HIDDEN_DIM // 8, HIDDEN_DIM // 4, HIDDEN_DIM // 2,
            HIDDEN_DIM, INPUT_DIM]

# packed layer order (10 layers total):
#   0..3  encoder Linear+SiLU
#   4     encoder head Linear (fan_out = 2*latent: lanes [0:8)=mu, [8:16)=logvar)
#   5..8  decoder Linear+SiLU
#   9     decoder output Linear (+Sigmoid)
N_LAYERS = 10


# ------------------------- shared math helpers -------------------------------
def _sigmoid(v):
    # exact: sigmoid(x) = 0.5*(tanh(x/2)+1); one EUP op, no VPU divide
    return 0.5 * (jnp.tanh(0.5 * v) + 1.0)


def _silu(v):
    return v * _sigmoid(v)


def _softplus(v):
    # numerically stable softplus (exp/log only -> guaranteed Mosaic lowering)
    return jnp.maximum(v, 0.0) + jnp.log(1.0 + jnp.exp(-jnp.abs(v)))


# ------------------------------- kernel -------------------------------------
def vae_kernel(x_ref, noise_ref, w_ref, b_ref, recon_ref, z_ref, loss_ref):
    """x_ref: (B, 64) f32; noise_ref: (B, 8) f32.
    w_ref: (10, 64, 128) bf16 packed weights (in, out), zero-padded.
    b_ref: (10, 1, 128) f32 packed biases, zero-padded.
    recon_ref: (B, 64) f32; z_ref: (B, 8) f32.
    loss_ref: (1, 128) f32 -> lanes 0/1/2 = loss / loss_recon / loss_kl.
    """

    def linear(lhs, i):
        # bf16 MXU matmul, f32 accumulation; contraction trimmed to lhs width.
        k = min(lhs.shape[1], K_PAD)
        return (jnp.dot(lhs[:, :k].astype(jnp.bfloat16), w_ref[i, :k, :],
                        preferred_element_type=jnp.float32)
                + b_ref[i])

    x = x_ref[...]                                     # (B, 64)

    # ---- encoder: 4 x (Linear + SiLU), then one merged mu/logvar head ------
    h = x
    for i in range(4):
        h = _silu(linear(h, i))                        # (B,128); padded lanes stay 0
    enc_out = linear(h, 4)                             # lanes [0:8)=mu, [8:16)=logvar
    mu = enc_out[:, :LATENT_DIM]                       # (B,8) lane-aligned (free)
    logvar = enc_out[:, LATENT_DIM:2 * LATENT_DIM]     # (B,8) one XLU lane realign
    # torch spec: scale = softplus(logvar) + eps (NOT exp(0.5*logvar))
    scale = _softplus(logvar) + EPS

    # ---- reparameterize: z = mu + scale * eps -------------------------------
    # TODO(synk): dist.rsample() randomness is supplied as the explicit `noise` input.
    z = mu + scale * noise_ref[...]                    # (B,8)
    z_ref[...] = z

    # ---- decoder: 4 x (Linear + SiLU) + Linear (+Sigmoid via exp below) -----
    g = z
    for i in range(5, 9):
        g = _silu(linear(g, i))
    logits = linear(g, 9)[:, :INPUT_DIM]               # (B,64)

    # sigmoid / BCE from logits, reusing one softplus:
    #   log(recon)   = logits - softplus(logits)
    #   log(1-recon) = -softplus(logits)
    sp = _softplus(logits)
    log_p_raw = logits - sp
    recon = jnp.exp(log_p_raw)                         # = sigmoid(logits) in [0,1]
    recon_ref[...] = recon

    # ---- reconstruction loss: BCE(recon, x + 0.5).sum(-1).mean() ------------
    target = x + 0.5
    log_p = jnp.maximum(log_p_raw, -100.0)             # torch clamp parity
    log_1mp = jnp.maximum(-sp, -100.0)
    bce = -(target * log_p + (1.0 - target) * log_1mp)          # (B,64)
    loss_recon = jnp.mean(jnp.sum(bce, axis=-1, keepdims=True),
                          axis=0, keepdims=True)                 # (1,1)

    # ---- KL( N(mu, diag(scale^2)) || N(0, I) ).mean() ------------------------
    kl = 0.5 * (scale * scale + mu * mu - 1.0) - jnp.log(scale)  # (B,8)
    loss_kl = jnp.mean(jnp.sum(kl, axis=-1, keepdims=True),
                       axis=0, keepdims=True)                    # (1,1)

    loss = loss_recon + loss_kl

    # pack the three scalars into one lane-dense (1,128) output tile
    lane = jax.lax.broadcasted_iota(jnp.int32, (1, PAD), 1)
    loss_ref[...] = jnp.where(
        lane == 0, loss,
        jnp.where(lane == 1, loss_recon,
                  jnp.where(lane == 2, loss_kl, 0.0)))


# ------------------------------ wrapper --------------------------------------
@jax.jit
def vae_forward(x, noise, w_all, b_all):
    """x: (B, INPUT_DIM) f32; noise: (B, LATENT_DIM) f32;
    w_all: (10, 64, 128) bf16; b_all: (10, 1, 128) f32 packed params."""
    b = x.shape[0]
    vmem = pl.BlockSpec(memory_space=pltpu.MemorySpace.VMEM)
    out_shape = (
        jax.ShapeDtypeStruct((b, INPUT_DIM), jnp.float32),   # recon
        jax.ShapeDtypeStruct((b, LATENT_DIM), jnp.float32),  # z
        jax.ShapeDtypeStruct((1, PAD), jnp.float32),         # packed losses
    )
    cost = pl.CostEstimate(
        flops=2 * b * K_PAD * PAD * N_LAYERS,
        transcendentals=14 * b * PAD,
        bytes_accessed=(w_all.size * w_all.dtype.itemsize
                        + b_all.size * b_all.dtype.itemsize
                        + 2 * (x.size + noise.size) * 4 + PAD * 4),
    )
    recon, z, losses = pl.pallas_call(
        vae_kernel,
        out_shape=out_shape,
        in_specs=[vmem, vmem, vmem, vmem],
        out_specs=(vmem, vmem, vmem),
        cost_estimate=cost,
    )(x.astype(jnp.float32), noise.astype(jnp.float32), w_all, b_all)

    return recon, z, losses[0, 0], losses[0, 1], losses[0, 2]


# --------------------- pure-JAX reference (same bf16 slabs) ------------------
@jax.jit
def vae_reference(x, noise, w_all, b_all):
    def linear(lhs, i):
        k = min(lhs.shape[1], K_PAD)
        return (jnp.dot(lhs[:, :k].astype(jnp.bfloat16), w_all[i, :k, :],
                        preferred_element_type=jnp.float32) + b_all[i])

    h = x
    for i in range(4):
        h = _silu(linear(h, i))
    enc_out = linear(h, 4)
    mu = enc_out[:, :LATENT_DIM]
    logvar = enc_out[:, LATENT_DIM:2 * LATENT_DIM]
    scale = _softplus(logvar) + EPS
    z = mu + scale * noise
    g = z
    for i in range(5, 9):
        g = _silu(linear(g, i))
    logits = linear(g, 9)[:, :INPUT_DIM]
    sp = _softplus(logits)
    log_p_raw = logits - sp
    recon = jnp.exp(log_p_raw)
    target = x + 0.5
    bce = -(target * jnp.maximum(log_p_raw, -100.0)
            + (1.0 - target) * jnp.maximum(-sp, -100.0))
    loss_recon = jnp.mean(jnp.sum(bce, axis=-1))
    kl = 0.5 * (scale * scale + mu * mu - 1.0) - jnp.log(scale)
    loss_kl = jnp.mean(jnp.sum(kl, axis=-1))
    return recon, z, loss_recon + loss_kl, loss_recon, loss_kl


# ------------------------------ param packing --------------------------------
def init_linear_params(key, dims):
    """Deterministic PyTorch-Linear-style init; weights stored (in, out)."""
    params = []
    for i in range(len(dims) - 1):
        fan_in, fan_out = dims[i], dims[i + 1]
        key, kw, kb = jax.random.split(key, 3)
        bound = 1.0 / (fan_in ** 0.5)
        w = jax.random.uniform(kw, (fan_in, fan_out), jnp.float32, -bound, bound)
        b = jax.random.uniform(kb, (1, fan_out), jnp.float32, -bound, bound)
        params += [w, b]
    return params, key


def pack_params(enc_params, dec_params):
    """Pack the 10 Linear layers into one zero-padded bf16 weight slab
    (10, 64, 128) plus one f32 bias slab (10, 1, 128)."""
    layers = []
    for i in range(5):
        layers.append((enc_params[2 * i], enc_params[2 * i + 1]))
    for i in range(5):
        layers.append((dec_params[2 * i], dec_params[2 * i + 1]))
    assert len(layers) == N_LAYERS

    w_all = np.zeros((N_LAYERS, K_PAD, PAD), np.float32)
    b_all = np.zeros((N_LAYERS, 1, PAD), np.float32)
    for i, (w, b) in enumerate(layers):
        w_np = np.asarray(w, np.float32)
        b_np = np.asarray(b, np.float32)
        w_all[i, :w_np.shape[0], :w_np.shape[1]] = w_np
        b_all[i, :, :b_np.shape[1]] = b_np
    return jnp.asarray(w_all).astype(jnp.bfloat16), jnp.asarray(b_all)


if __name__ == "__main__":
    key = jax.random.PRNGKey(0)
    key, kx, kn = jax.random.split(key, 3)

    # Input in [-0.5, 0.5] so the BCE target x + 0.5 is a valid probability.
    x = jax.random.uniform(kx, (BATCH, INPUT_DIM), jnp.float32, -0.5, 0.5)
    noise = jax.random.normal(kn, (BATCH, LATENT_DIM), jnp.float32)

    enc_params, key = init_linear_params(key, ENC_DIMS)
    dec_params, key = init_linear_params(key, DEC_DIMS)
    # Pack once, outside the per-call path (params are call-invariant).
    w_all, b_all = pack_params(enc_params, dec_params)

    recon, z, loss, loss_recon, loss_kl = jax.block_until_ready(
        vae_forward(x, noise, w_all, b_all))

    # structural checks
    assert recon.shape == (BATCH, INPUT_DIM)
    assert z.shape == (BATCH, LATENT_DIM)
    assert bool(jnp.isfinite(loss)) and bool(jnp.isfinite(loss_recon))
    assert bool(jnp.isfinite(loss_kl))
    assert bool(jnp.all(recon >= 0.0)) and bool(jnp.all(recon <= 1.0))

    # numeric check against a pure-JAX reference using the same bf16 slabs
    r_recon, r_z, r_loss, r_lr, r_lk = jax.block_until_ready(
        vae_reference(x, noise, w_all, b_all))
    assert bool(jnp.allclose(recon, r_recon, atol=1e-2, rtol=1e-2))
    assert bool(jnp.allclose(z, r_z, atol=1e-2, rtol=1e-2))
    assert bool(jnp.allclose(jnp.stack([loss, loss_recon, loss_kl]),
                             jnp.stack([r_loss, r_lr, r_lk]),
                             atol=5e-2, rtol=2e-2))
    print("KERNEL_OK")
</pallas_src>

<mosaic_0001>
module attributes {stable_mosaic.version = 11 : i64} {
  func.func @vae_kernel(%arg0: memref<8x64xf32, #tpu.memory_space<vmem>>, %arg1: memref<8x8xf32, #tpu.memory_space<vmem>>, %arg2: memref<10x64x128xbf16, #tpu.memory_space<vmem>>, %arg3: memref<10x1x128xf32, #tpu.memory_space<vmem>>, %arg4: memref<8x64xf32, #tpu.memory_space<vmem>>, %arg5: memref<8x8xf32, #tpu.memory_space<vmem>>, %arg6: memref<1x128xf32, #tpu.memory_space<vmem>>) attributes {dimension_semantics = [], scalar_prefetch = 0 : i64, scratch_operands = 0 : i64, tpu.core_type = #tpu.core_type<tc>} {
    %c0 = arith.constant 0 : index
    %c0_0 = arith.constant 0 : index
    %0 = vector.load %arg0[%c0, %c0_0] : memref<8x64xf32, #tpu.memory_space<vmem>>, vector<8x64xf32>
    %1 = arith.truncf %0 : vector<8x64xf32> to vector<8x64xbf16>
    %c0_1 = arith.constant 0 : index
    %c0_2 = arith.constant 0 : index
    %c0_3 = arith.constant 0 : index
    %2 = vector.load %arg2[%c0_1, %c0_2, %c0_3] : memref<10x64x128xbf16, #tpu.memory_space<vmem>>, vector<1x64x128xbf16>
    %3 = vector.shape_cast %2 : vector<1x64x128xbf16> to vector<64x128xbf16>
    %cst = arith.constant dense<0.000000e+00> : vector<8x128xf32>
    %4 = tpu.matmul %1, %3, %cst {dimension_numbers = #tpu.dot_dimension_numbers<[1], [0], [0], [1], [0, 0, 1, 1], [], []>} : vector<8x64xbf16>, vector<64x128xbf16>, vector<8x128xf32> -> vector<8x128xf32>
    %c0_4 = arith.constant 0 : index
    %c0_5 = arith.constant 0 : index
    %c0_6 = arith.constant 0 : index
    %5 = vector.load %arg3[%c0_4, %c0_5, %c0_6] : memref<10x1x128xf32, #tpu.memory_space<vmem>>, vector<1x1x128xf32>
    %6 = vector.shape_cast %5 : vector<1x1x128xf32> to vector<1x128xf32>
    %7 = vector.broadcast %6 : vector<1x128xf32> to vector<8x128xf32>
    %8 = arith.addf %4, %7 : vector<8x128xf32>
    %cst_7 = arith.constant 5.000000e-01 : f32
    %9 = vector.broadcast %cst_7 : f32 to vector<8x128xf32>
    %10 = arith.mulf %9, %8 : vector<8x128xf32>
    %11 = math.tanh %10 : vector<8x128xf32>
    %cst_8 = arith.constant 1.000000e+00 : f32
    %12 = vector.broadcast %cst_8 : f32 to vector<8x128xf32>
    %13 = arith.addf %11, %12 : vector<8x128xf32>
    %cst_9 = arith.constant 5.000000e-01 : f32
    %14 = vector.broadcast %cst_9 : f32 to vector<8x128xf32>
    %15 = arith.mulf %14, %13 : vector<8x128xf32>
    %16 = arith.mulf %8, %15 : vector<8x128xf32>
    %17 = vector.extract_strided_slice %16 {offsets = [0, 0], sizes = [8, 64], strides = [1, 1]} : vector<8x128xf32> to vector<8x64xf32>
    %18 = arith.truncf %17 : vector<8x64xf32> to vector<8x64xbf16>
    %c1 = arith.constant 1 : index
    %c0_10 = arith.constant 0 : index
    %c0_11 = arith.constant 0 : index
    %19 = vector.load %arg2[%c1, %c0_10, %c0_11] : memref<10x64x128xbf16, #tpu.memory_space<vmem>>, vector<1x64x128xbf16>
    %20 = vector.shape_cast %19 : vector<1x64x128xbf16> to vector<64x128xbf16>
    %cst_12 = arith.constant dense<0.000000e+00> : vector<8x128xf32>
    %21 = tpu.matmul %18, %20, %cst_12 {dimension_numbers = #tpu.dot_dimension_numbers<[1], [0], [0], [1], [0, 0, 1, 1], [], []>} : vector<8x64xbf16>, vector<64x128xbf16>, vector<8x128xf32> -> vector<8x128xf32>
    %c1_13 = arith.constant 1 : index
    %c0_14 = arith.constant 0 : index
    %c0_15 = arith.constant 0 : index
    %22 = vector.load %arg3[%c1_13, %c0_14, %c0_15] : memref<10x1x128xf32, #tpu.memory_space<vmem>>, vector<1x1x128xf32>
    %23 = vector.shape_cast %22 : vector<1x1x128xf32> to vector<1x128xf32>
    %24 = vector.broadcast %23 : vector<1x128xf32> to vector<8x128xf32>
    %25 = arith.addf %21, %24 : vector<8x128xf32>
    %cst_16 = arith.constant 5.000000e-01 : f32
    %26 = vector.broadcast %cst_16 : f32 to vector<8x128xf32>
    %27 = arith.mulf %26, %25 : vector<8x128xf32>
    %28 = math.tanh %27 : vector<8x128xf32>
    %cst_17 = arith.constant 1.000000e+00 : f32
    %29 = vector.broadcast %cst_17 : f32 to vector<8x128xf32>
    %30 = arith.addf %28, %29 : vector<8x128xf32>
    %cst_18 = arith.constant 5.000000e-01 : f32
    %31 = vector.broadcast %cst_18 : f32 to vector<8x128xf32>
    %32 = arith.mulf %31, %30 : vector<8x128xf32>
    %33 = arith.mulf %25, %32 : vector<8x128xf32>
    %34 = vector.extract_strided_slice %33 {offsets = [0, 0], sizes = [8, 64], strides = [1, 1]} : vector<8x128xf32> to vector<8x64xf32>
    %35 = arith.truncf %34 : vector<8x64xf32> to vector<8x64xbf16>
    %c2 = arith.constant 2 : index
    %c0_19 = arith.constant 0 : index
    %c0_20 = arith.constant 0 : index
    %36 = vector.load %arg2[%c2, %c0_19, %c0_20] : memref<10x64x128xbf16, #tpu.memory_space<vmem>>, vector<1x64x128xbf16>
    %37 = vector.shape_cast %36 : vector<1x64x128xbf16> to vector<64x128xbf16>
    %cst_21 = arith.constant dense<0.000000e+00> : vector<8x128xf32>
    %38 = tpu.matmul %35, %37, %cst_21 {dimension_numbers = #tpu.dot_dimension_numbers<[1], [0], [0], [1], [0, 0, 1, 1], [], []>} : vector<8x64xbf16>, vector<64x128xbf16>, vector<8x128xf32> -> vector<8x128xf32>
    %c2_22 = arith.constant 2 : index
    %c0_23 = arith.constant 0 : index
    %c0_24 = arith.constant 0 : index
    %39 = vector.load %arg3[%c2_22, %c0_23, %c0_24] : memref<10x1x128xf32, #tpu.memory_space<vmem>>, vector<1x1x128xf32>
    %40 = vector.shape_cast %39 : vector<1x1x128xf32> to vector<1x128xf32>
    %41 = vector.broadcast %40 : vector<1x128xf32> to vector<8x128xf32>
    %42 = arith.addf %38, %41 : vector<8x128xf32>
    %cst_25 = arith.constant 5.000000e-01 : f32
    %43 = vector.broadcast %cst_25 : f32 to vector<8x128xf32>
    %44 = arith.mulf %43, %42 : vector<8x128xf32>
    %45 = math.tanh %44 : vector<8x128xf32>
    %cst_26 = arith.constant 1.000000e+00 : f32
    %46 = vector.broadcast %cst_26 : f32 to vector<8x128xf32>
    %47 = arith.addf %45, %46 : vector<8x128xf32>
    %cst_27 = arith.constant 5.000000e-01 : f32
    %48 = vector.broadcast %cst_27 : f32 to vector<8x128xf32>
    %49 = arith.mulf %48, %47 : vector<8x128xf32>
    %50 = arith.mulf %42, %49 : vector<8x128xf32>
    %51 = vector.extract_strided_slice %50 {offsets = [0, 0], sizes = [8, 64], strides = [1, 1]} : vector<8x128xf32> to vector<8x64xf32>
    %52 = arith.truncf %51 : vector<8x64xf32> to vector<8x64xbf16>
    %c3 = arith.constant 3 : index
    %c0_28 = arith.constant 0 : index
    %c0_29 = arith.constant 0 : index
    %53 = vector.load %arg2[%c3, %c0_28, %c0_29] : memref<10x64x128xbf16, #tpu.memory_space<vmem>>, vector<1x64x128xbf16>
    %54 = vector.shape_cast %53 : vector<1x64x128xbf16> to vector<64x128xbf16>
    %cst_30 = arith.constant dense<0.000000e+00> : vector<8x128xf32>
    %55 = tpu.matmul %52, %54, %cst_30 {dimension_numbers = #tpu.dot_dimension_numbers<[1], [0], [0], [1], [0, 0, 1, 1], [], []>} : vector<8x64xbf16>, vector<64x128xbf16>, vector<8x128xf32> -> vector<8x128xf32>
    %c3_31 = arith.constant 3 : index
    %c0_32 = arith.constant 0 : index
    %c0_33 = arith.constant 0 : index
    %56 = vector.load %arg3[%c3_31, %c0_32, %c0_33] : memref<10x1x128xf32, #tpu.memory_space<vmem>>, vector<1x1x128xf32>
    %57 = vector.shape_cast %56 : vector<1x1x128xf32> to vector<1x128xf32>
    %58 = vector.broadcast %57 : vector<1x128xf32> to vector<8x128xf32>
    %59 = arith.addf %55, %58 : vector<8x128xf32>
    %cst_34 = arith.constant 5.000000e-01 : f32
    %60 = vector.broadcast %cst_34 : f32 to vector<8x128xf32>
    %61 = arith.mulf %60, %59 : vector<8x128xf32>
    %62 = math.tanh %61 : vector<8x128xf32>
    %cst_35 = arith.constant 1.000000e+00 : f32
    %63 = vector.broadcast %cst_35 : f32 to vector<8x128xf32>
    %64 = arith.addf %62, %63 : vector<8x128xf32>
    %cst_36 = arith.constant 5.000000e-01 : f32
    %65 = vector.broadcast %cst_36 : f32 to vector<8x128xf32>
    %66 = arith.mulf %65, %64 : vector<8x128xf32>
    %67 = arith.mulf %59, %66 : vector<8x128xf32>
    %68 = vector.extract_strided_slice %67 {offsets = [0, 0], sizes = [8, 64], strides = [1, 1]} : vector<8x128xf32> to vector<8x64xf32>
    %69 = arith.truncf %68 : vector<8x64xf32> to vector<8x64xbf16>
    %c4 = arith.constant 4 : index
    %c0_37 = arith.constant 0 : index
    %c0_38 = arith.constant 0 : index
    %70 = vector.load %arg2[%c4, %c0_37, %c0_38] : memref<10x64x128xbf16, #tpu.memory_space<vmem>>, vector<1x64x128xbf16>
    %71 = vector.shape_cast %70 : vector<1x64x128xbf16> to vector<64x128xbf16>
    %cst_39 = arith.constant dense<0.000000e+00> : vector<8x128xf32>
    %72 = tpu.matmul %69, %71, %cst_39 {dimension_numbers = #tpu.dot_dimension_numbers<[1], [0], [0], [1], [0, 0, 1, 1], [], []>} : vector<8x64xbf16>, vector<64x128xbf16>, vector<8x128xf32> -> vector<8x128xf32>
    %c4_40 = arith.constant 4 : index
    %c0_41 = arith.constant 0 : index
    %c0_42 = arith.constant 0 : index
    %73 = vector.load %arg3[%c4_40, %c0_41, %c0_42] : memref<10x1x128xf32, #tpu.memory_space<vmem>>, vector<1x1x128xf32>
    %74 = vector.shape_cast %73 : vector<1x1x128xf32> to vector<1x128xf32>
    %75 = vector.broadcast %74 : vector<1x128xf32> to vector<8x128xf32>
    %76 = arith.addf %72, %75 : vector<8x128xf32>
    %77 = vector.extract_strided_slice %76 {offsets = [0, 0], sizes = [8, 8], strides = [1, 1]} : vector<8x128xf32> to vector<8x8xf32>
    %78 = vector.extract_strided_slice %76 {offsets = [0, 8], sizes = [8, 8], strides = [1, 1]} : vector<8x128xf32> to vector<8x8xf32>
    %cst_43 = arith.constant 0.000000e+00 : f32
    %79 = vector.broadcast %cst_43 : f32 to vector<8x8xf32>
    %80 = arith.maximumf %78, %79 : vector<8x8xf32>
    %81 = math.absf %78 : vector<8x8xf32>
    %cst_44 = arith.constant 0.000000e+00 : f32
    %82 = vector.broadcast %cst_44 : f32 to vector<8x8xf32>
    %83 = arith.subf %82, %81 : vector<8x8xf32>
    %84 = math.exp %83 : vector<8x8xf32>
    %cst_45 = arith.constant 1.000000e+00 : f32
    %85 = vector.broadcast %cst_45 : f32 to vector<8x8xf32>
    %86 = arith.addf %85, %84 : vector<8x8xf32>
    %87 = math.log %86 : vector<8x8xf32>
    %88 = arith.addf %80, %87 : vector<8x8xf32>
    %cst_46 = arith.constant 9.99999993E-9 : f32
    %89 = vector.broadcast %cst_46 : f32 to vector<8x8xf32>
    %90 = arith.addf %88, %89 : vector<8x8xf32>
    %c0_47 = arith.constant 0 : index
    %c0_48 = arith.constant 0 : index
    %91 = vector.load %arg1[%c0_47, %c0_48] : memref<8x8xf32, #tpu.memory_space<vmem>>, vector<8x8xf32>
    %92 = arith.mulf %90, %91 : vector<8x8xf32>
    %93 = arith.addf %77, %92 : vector<8x8xf32>
    %c0_49 = arith.constant 0 : index
    %c0_50 = arith.constant 0 : index
    %94 = vector.load %arg5[%c0_49, %c0_50] : memref<8x8xf32, #tpu.memory_space<vmem>>, vector<8x8xf32>
    tpu.vector_store %arg5[%c0_49, %c0_50], %93 {strides = array<i32>} : memref<8x8xf32, #tpu.memory_space<vmem>>, vector<8x8xf32>,
    %95 = arith.truncf %93 : vector<8x8xf32> to vector<8x8xbf16>
    %c5 = arith.constant 5 : index
    %c0_51 = arith.constant 0 : index
    %c0_52 = arith.constant 0 : index
    %96 = vector.load %arg2[%c5, %c0_51, %c0_52] : memref<10x64x128xbf16, #tpu.memory_space<vmem>>, vector<1x8x128xbf16>
    %97 = vector.shape_cast %96 : vector<1x8x128xbf16> to vector<8x128xbf16>
    %cst_53 = arith.constant dense<0.000000e+00> : vector<8x128xf32>
    %98 = tpu.matmul %95, %97, %cst_53 {dimension_numbers = #tpu.dot_dimension_numbers<[1], [0], [0], [1], [0, 0, 1, 1], [], []>} : vector<8x8xbf16>, vector<8x128xbf16>, vector<8x128xf32> -> vector<8x128xf32>
    %c5_54 = arith.constant 5 : index
    %c0_55 = arith.constant 0 : index
    %c0_56 = arith.constant 0 : index
    %99 = vector.load %arg3[%c5_54, %c0_55, %c0_56] : memref<10x1x128xf32, #tpu.memory_space<vmem>>, vector<1x1x128xf32>
    %100 = vector.shape_cast %99 : vector<1x1x128xf32> to vector<1x128xf32>
    %101 = vector.broadcast %100 : vector<1x128xf32> to vector<8x128xf32>
    %102 = arith.addf %98, %101 : vector<8x128xf32>
    %cst_57 = arith.constant 5.000000e-01 : f32
    %103 = vector.broadcast %cst_57 : f32 to vector<8x128xf32>
    %104 = arith.mulf %103, %102 : vector<8x128xf32>
    %105 = math.tanh %104 : vector<8x128xf32>
    %cst_58 = arith.constant 1.000000e+00 : f32
    %106 = vector.broadcast %cst_58 : f32 to vector<8x128xf32>
    %107 = arith.addf %105, %106 : vector<8x128xf32>
    %cst_59 = arith.constant 5.000000e-01 : f32
    %108 = vector.broadcast %cst_59 : f32 to vector<8x128xf32>
    %109 = arith.mulf %108, %107 : vector<8x128xf32>
    %110 = arith.mulf %102, %109 : vector<8x128xf32>
    %111 = vector.extract_strided_slice %110 {offsets = [0, 0], sizes = [8, 64], strides = [1, 1]} : vector<8x128xf32> to vector<8x64xf32>
    %112 = arith.truncf %111 : vector<8x64xf32> to vector<8x64xbf16>
    %c6 = arith.constant 6 : index
    %c0_60 = arith.constant 0 : index
    %c0_61 = arith.constant 0 : index
    %113 = vector.load %arg2[%c6, %c0_60, %c0_61] : memref<10x64x128xbf16, #tpu.memory_space<vmem>>, vector<1x64x128xbf16>
    %114 = vector.shape_cast %113 : vector<1x64x128xbf16> to vector<64x128xbf16>
    %cst_62 = arith.constant dense<0.000000e+00> : vector<8x128xf32>
    %115 = tpu.matmul %112, %114, %cst_62 {dimension_numbers = #tpu.dot_dimension_numbers<[1], [0], [0], [1], [0, 0, 1, 1], [], []>} : vector<8x64xbf16>, vector<64x128xbf16>, vector<8x128xf32> -> vector<8x128xf32>
    %c6_63 = arith.constant 6 : index
    %c0_64 = arith.constant 0 : index
    %c0_65 = arith.constant 0 : index
    %116 = vector.load %arg3[%c6_63, %c0_64, %c0_65] : memref<10x1x128xf32, #tpu.memory_space<vmem>>, vector<1x1x128xf32>
    %117 = vector.shape_cast %116 : vector<1x1x128xf32> to vector<1x128xf32>
    %118 = vector.broadcast %117 : vector<1x128xf32> to vector<8x128xf32>
    %119 = arith.addf %115, %118 : vector<8x128xf32>
    %cst_66 = arith.constant 5.000000e-01 : f32
    %120 = vector.broadcast %cst_66 : f32 to vector<8x128xf32>
    %121 = arith.mulf %120, %119 : vector<8x128xf32>
    %122 = math.tanh %121 : vector<8x128xf32>
    %cst_67 = arith.constant 1.000000e+00 : f32
    %123 = vector.broadcast %cst_67 : f32 to vector<8x128xf32>
    %124 = arith.addf %122, %123 : vector<8x128xf32>
    %cst_68 = arith.constant 5.000000e-01 : f32
    %125 = vector.broadcast %cst_68 : f32 to vector<8x128xf32>
    %126 = arith.mulf %125, %124 : vector<8x128xf32>
    %127 = arith.mulf %119, %126 : vector<8x128xf32>
    %128 = vector.extract_strided_slice %127 {offsets = [0, 0], sizes = [8, 64], strides = [1, 1]} : vector<8x128xf32> to vector<8x64xf32>
    %129 = arith.truncf %128 : vector<8x64xf32> to vector<8x64xbf16>
    %c7 = arith.constant 7 : index
    %c0_69 = arith.constant 0 : index
    %c0_70 = arith.constant 0 : index
    %130 = vector.load %arg2[%c7, %c0_69, %c0_70] : memref<10x64x128xbf16, #tpu.memory_space<vmem>>, vector<1x64x128xbf16>
    %131 = vector.shape_cast %130 : vector<1x64x128xbf16> to vector<64x128xbf16>
    %cst_71 = arith.constant dense<0.000000e+00> : vector<8x128xf32>
    %132 = tpu.matmul %129, %131, %cst_71 {dimension_numbers = #tpu.dot_dimension_numbers<[1], [0], [0], [1], [0, 0, 1, 1], [], []>} : vector<8x64xbf16>, vector<64x128xbf16>, vector<8x128xf32> -> vector<8x128xf32>
    %c7_72 = arith.constant 7 : index
    %c0_73 = arith.constant 0 : index
    %c0_74 = arith.constant 0 : index
    %133 = vector.load %arg3[%c7_72, %c0_73, %c0_74] : memref<10x1x128xf32, #tpu.memory_space<vmem>>, vector<1x1x128xf32>
    %134 = vector.shape_cast %133 : vector<1x1x128xf32> to vector<1x128xf32>
    %135 = vector.broadcast %134 : vector<1x128xf32> to vector<8x128xf32>
    %136 = arith.addf %132, %135 : vector<8x128xf32>
    %cst_75 = arith.constant 5.000000e-01 : f32
    %137 = vector.broadcast %cst_75 : f32 to vector<8x128xf32>
    %138 = arith.mulf %137, %136 : vector<8x128xf32>
    %139 = math.tanh %138 : vector<8x128xf32>
    %cst_76 = arith.constant 1.000000e+00 : f32
    %140 = vector.broadcast %cst_76 : f32 to vector<8x128xf32>
    %141 = arith.addf %139, %140 : vector<8x128xf32>
    %cst_77 = arith.constant 5.000000e-01 : f32
    %142 = vector.broadcast %cst_77 : f32 to vector<8x128xf32>
    %143 = arith.mulf %142, %141 : vector<8x128xf32>
    %144 = arith.mulf %136, %143 : vector<8x128xf32>
    %145 = vector.extract_strided_slice %144 {offsets = [0, 0], sizes = [8, 64], strides = [1, 1]} : vector<8x128xf32> to vector<8x64xf32>
    %146 = arith.truncf %145 : vector<8x64xf32> to vector<8x64xbf16>
    %c8 = arith.constant 8 : index
    %c0_78 = arith.constant 0 : index
    %c0_79 = arith.constant 0 : index
    %147 = vector.load %arg2[%c8, %c0_78, %c0_79] : memref<10x64x128xbf16, #tpu.memory_space<vmem>>, vector<1x64x128xbf16>
    %148 = vector.shape_cast %147 : vector<1x64x128xbf16> to vector<64x128xbf16>
    %cst_80 = arith.constant dense<0.000000e+00> : vector<8x128xf32>
    %149 = tpu.matmul %146, %148, %cst_80 {dimension_numbers = #tpu.dot_dimension_numbers<[1], [0], [0], [1], [0, 0, 1, 1], [], []>} : vector<8x64xbf16>, vector<64x128xbf16>, vector<8x128xf32> -> vector<8x128xf32>
    %c8_81 = arith.constant 8 : index
    %c0_82 = arith.constant 0 : index
    %c0_83 = arith.constant 0 : index
    %150 = vector.load %arg3[%c8_81, %c0_82, %c0_83] : memref<10x1x128xf32, #tpu.memory_space<vmem>>, vector<1x1x128xf32>
    %151 = vector.shape_cast %150 : vector<1x1x128xf32> to vector<1x128xf32>
    %152 = vector.broadcast %151 : vector<1x128xf32> to vector<8x128xf32>
    %153 = arith.addf %149, %152 : vector<8x128xf32>
    %cst_84 = arith.constant 5.000000e-01 : f32
    %154 = vector.broadcast %cst_84 : f32 to vector<8x128xf32>
    %155 = arith.mulf %154, %153 : vector<8x128xf32>
    %156 = math.tanh %155 : vector<8x128xf32>
    %cst_85 = arith.constant 1.000000e+00 : f32
    %157 = vector.broadcast %cst_85 : f32 to vector<8x128xf32>
    %158 = arith.addf %156, %157 : vector<8x128xf32>
    %cst_86 = arith.constant 5.000000e-01 : f32
    %159 = vector.broadcast %cst_86 : f32 to vector<8x128xf32>
    %160 = arith.mulf %159, %158 : vector<8x128xf32>
    %161 = arith.mulf %153, %160 : vector<8x128xf32>
    %162 = vector.extract_strided_slice %161 {offsets = [0, 0], sizes = [8, 64], strides = [1, 1]} : vector<8x128xf32> to vector<8x64xf32>
    %163 = arith.truncf %162 : vector<8x64xf32> to vector<8x64xbf16>
    %c9 = arith.constant 9 : index
    %c0_87 = arith.constant 0 : index
    %c0_88 = arith.constant 0 : index
    %164 = vector.load %arg2[%c9, %c0_87, %c0_88] : memref<10x64x128xbf16, #tpu.memory_space<vmem>>, vector<1x64x128xbf16>
    %165 = vector.shape_cast %164 : vector<1x64x128xbf16> to vector<64x128xbf16>
    %cst_89 = arith.constant dense<0.000000e+00> : vector<8x128xf32>
    %166 = tpu.matmul %163, %165, %cst_89 {dimension_numbers = #tpu.dot_dimension_numbers<[1], [0], [0], [1], [0, 0, 1, 1], [], []>} : vector<8x64xbf16>, vector<64x128xbf16>, vector<8x128xf32> -> vector<8x128xf32>
    %c9_90 = arith.constant 9 : index
    %c0_91 = arith.constant 0 : index
    %c0_92 = arith.constant 0 : index
    %167 = vector.load %arg3[%c9_90, %c0_91, %c0_92] : memref<10x1x128xf32, #tpu.memory_space<vmem>>, vector<1x1x128xf32>
    %168 = vector.shape_cast %167 : vector<1x1x128xf32> to vector<1x128xf32>
    %169 = vector.broadcast %168 : vector<1x128xf32> to vector<8x128xf32>
    %170 = arith.addf %166, %169 : vector<8x128xf32>
    %171 = vector.extract_strided_slice %170 {offsets = [0, 0], sizes = [8, 64], strides = [1, 1]} : vector<8x128xf32> to vector<8x64xf32>
    %cst_93 = arith.constant 0.000000e+00 : f32
    %172 = vector.broadcast %cst_93 : f32 to vector<8x64xf32>
    %173 = arith.maximumf %171, %172 : vector<8x64xf32>
    %174 = math.absf %171 : vector<8x64xf32>
    %cst_94 = arith.constant 0.000000e+00 : f32
    %175 = vector.broadcast %cst_94 : f32 to vector<8x64xf32>
    %176 = arith.subf %175, %174 : vector<8x64xf32>
    %177 = math.exp %176 : vector<8x64xf32>
    %cst_95 = arith.constant 1.000000e+00 : f32
    %178 = vector.broadcast %cst_95 : f32 to vector<8x64xf32>
    %179 = arith.addf %178, %177 : vector<8x64xf32>
    %180 = math.log %179 : vector<8x64xf32>
    %181 = arith.addf %173, %180 : vector<8x64xf32>
    %182 = arith.subf %171, %181 : vector<8x64xf32>
    %183 = math.exp %182 : vector<8x64xf32>
    %c0_96 = arith.constant 0 : index
    %c0_97 = arith.constant 0 : index
    %184 = vector.load %arg4[%c0_96, %c0_97] : memref<8x64xf32, #tpu.memory_space<vmem>>, vector<8x64xf32>
    tpu.vector_store %arg4[%c0_96, %c0_97], %183 {strides = array<i32>} : memref<8x64xf32, #tpu.memory_space<vmem>>, vector<8x64xf32>,
    %cst_98 = arith.constant 5.000000e-01 : f32
    %185 = vector.broadcast %cst_98 : f32 to vector<8x64xf32>
    %186 = arith.addf %0, %185 : vector<8x64xf32>
    %cst_99 = arith.constant -1.000000e+02 : f32
    %187 = vector.broadcast %cst_99 : f32 to vector<8x64xf32>
    %188 = arith.maximumf %182, %187 : vector<8x64xf32>
    %cst_100 = arith.constant 0.000000e+00 : f32
    %189 = vector.broadcast %cst_100 : f32 to vector<8x64xf32>
    %190 = arith.subf %189, %181 : vector<8x64xf32>
    %cst_101 = arith.constant -1.000000e+02 : f32
    %191 = vector.broadcast %cst_101 : f32 to vector<8x64xf32>
    %192 = arith.maximumf %190, %191 : vector<8x64xf32>
    %193 = arith.mulf %186, %188 : vector<8x64xf32>
    %cst_102 = arith.constant 1.000000e+00 : f32
    %194 = vector.broadcast %cst_102 : f32 to vector<8x64xf32>
    %195 = arith.subf %194, %186 : vector<8x64xf32>
    %196 = arith.mulf %195, %192 : vector<8x64xf32>
    %197 = arith.addf %193, %196 : vector<8x64xf32>
    %cst_103 = arith.constant 0.000000e+00 : f32
    %198 = vector.broadcast %cst_103 : f32 to vector<8x64xf32>
    %199 = arith.subf %198, %197 : vector<8x64xf32>
    %cst_104 = arith.constant dense<0.000000e+00> : vector<8xf32>
    %200 = vector.multi_reduction <add>, %199, %cst_104 [1] : vector<8x64xf32> to vector<8xf32>
    %201 = vector.shape_cast %200 : vector<8xf32> to vector<8x1xf32>
    %cst_105 = arith.constant dense<0.000000e+00> : vector<1xf32>
    %202 = vector.multi_reduction <add>, %201, %cst_105 [0] : vector<8x1xf32> to vector<1xf32>
    %203 = vector.shape_cast %202 : vector<1xf32> to vector<1x1xf32>
    %cst_106 = arith.constant 8.000000e+00 : f32
    %204 = vector.broadcast %cst_106 : f32 to vector<1x1xf32>
    %205 = arith.divf %203, %204 : vector<1x1xf32>
    %206 = arith.mulf %90, %90 : vector<8x8xf32>
    %207 = arith.mulf %77, %77 : vector<8x8xf32>
    %208 = arith.addf %206, %207 : vector<8x8xf32>
    %cst_107 = arith.constant 1.000000e+00 : f32
    %209 = vector.broadcast %cst_107 : f32 to vector<8x8xf32>
    %210 = arith.subf %208, %209 : vector<8x8xf32>
    %cst_108 = arith.constant 5.000000e-01 : f32
    %211 = vector.broadcast %cst_108 : f32 to vector<8x8xf32>
    %212 = arith.mulf %211, %210 : vector<8x8xf32>
    %213 = math.log %90 : vector<8x8xf32>
    %214 = arith.subf %212, %213 : vector<8x8xf32>
    %cst_109 = arith.constant dense<0.000000e+00> : vector<8xf32>
    %215 = vector.multi_reduction <add>, %214, %cst_109 [1] : vector<8x8xf32> to vector<8xf32>
    %216 = vector.shape_cast %215 : vector<8xf32> to vector<8x1xf32>
    %cst_110 = arith.constant dense<0.000000e+00> : vector<1xf32>
    %217 = vector.multi_reduction <add>, %216, %cst_110 [0] : vector<8x1xf32> to vector<1xf32>
    %218 = vector.shape_cast %217 : vector<1xf32> to vector<1x1xf32>
    %cst_111 = arith.constant 8.000000e+00 : f32
    %219 = vector.broadcast %cst_111 : f32 to vector<1x1xf32>
    %220 = arith.divf %218, %219 : vector<1x1xf32>
    %221 = arith.addf %205, %220 : vector<1x1xf32>
    %222 = tpu.iota {dimensions = array<i32: 1>} : vector<1x128xi32>
    %c0_i32 = arith.constant 0 : i32
    %223 = vector.broadcast %c0_i32 : i32 to vector<1x128xi32>
    %224 = arith.cmpi eq, %222, %223 : vector<1x128xi32>
    %c1_i32 = arith.constant 1 : i32
    %225 = vector.broadcast %c1_i32 : i32 to vector<1x128xi32>
    %226 = arith.cmpi eq, %222, %225 : vector<1x128xi32>
    %c2_i32 = arith.constant 2 : i32
    %227 = vector.broadcast %c2_i32 : i32 to vector<1x128xi32>
    %228 = arith.cmpi eq, %222, %227 : vector<1x128xi32>
    %cst_112 = arith.constant 0.000000e+00 : f32
    %229 = vector.shape_cast %220 : vector<1x1xf32> to vector<1x1xf32>
    %230 = vector.broadcast %229 : vector<1x1xf32> to vector<1x128xf32>
    %231 = vector.broadcast %cst_112 : f32 to vector<1x128xf32>
    %232 = arith.select %228, %230, %231 : vector<1x128xi1>, vector<1x128xf32>
    %233 = vector.shape_cast %205 : vector<1x1xf32> to vector<1x1xf32>
    %234 = vector.broadcast %233 : vector<1x1xf32> to vector<1x128xf32>
    %235 = arith.select %226, %234, %232 : vector<1x128xi1>, vector<1x128xf32>
    %236 = vector.shape_cast %221 : vector<1x1xf32> to vector<1x1xf32>
    %237 = vector.broadcast %236 : vector<1x1xf32> to vector<1x128xf32>
    %238 = arith.select %224, %237, %235 : vector<1x128xi1>, vector<1x128xf32>
    %c0_113 = arith.constant 0 : index
    %c0_114 = arith.constant 0 : index
    %239 = vector.load %arg6[%c0_113, %c0_114] : memref<1x128xf32, #tpu.memory_space<vmem>>, vector<1x128xf32>
    tpu.vector_store %arg6[%c0_113, %c0_114], %238 {strides = array<i32>} : memref<1x128xf32, #tpu.memory_space<vmem>>, vector<1x128xf32>,
    return
  }
}

</mosaic_0001>

<bundles_post_ra>
// kernel: vae_forward.1
= control target key start
LH: loop header
LB: loop body
LE: loop exit
PB: predicated region body
PF: predicated region fallthrough
CT: control target
= control target key end

     0   :  { %12 = vsyncpa [#allocation3], 0  ;;  %s1683_s0 = inlined_call_operand.hbm [shape: f32[8,64], index: 0, kind: input, shape index: {}]   ;;  %s1684_s1 = inlined_call_operand.hbm [shape: f32[8,8], index: 1, kind: input, shape index: {}]   ;;  %s1685_s2 = inlined_call_operand.hbm [shape: bf16[10,64,128], index: 2, kind: input, shape index: {}]   ;;  %s1686_s3 = inlined_call_operand.vmem [shape: f32[10,1,128], index: 3, kind: input, shape index: {}]   ;;  %s1687_s4 = inlined_call_operand.hbm [shape: f32[8,64], index: 4, kind: output, shape index: {0}]   ;;  %s1688_s5 = inlined_call_operand.hbm [shape: f32[8,8], index: 5, kind: output, shape index: {1}]   ;;  %s1689_s6 = inlined_call_operand.vmem [shape: f32[1,128], index: 6, kind: output, shape index: {2}]  }
   0x1   :  { %13 = vsyncpa [#allocation6], 0 }
   0x2   :  { %14 = vsyncpa [#allocation4], 0 }
   0x3   :  { %15 = vsyncpa [#allocation10], 0  ;;  %s1469_s21 = smov [#allocation5]   ;;  %s1470_s23 = smov [#allocation2]  }
   0x4   :  { %s32_s22 = sshll.u32 %s1469_s21, 4  ;;  %s22_s24 = sshll.u32 %s1470_s23, 4  ;;  %s33_s22 = int_to_ptr.vmem [resolvable:$true] %s32_s22  ;;  %s23_s24 = int_to_ptr.vmem [resolvable:$true] %s22_s24 }
   0x5   :  { %s1351_s27 = scalar_lea.hbm %s1684_s1, 128 }
   0x6   :  { %p1352_p0 = scmp.ne.s32.totalorder %s1684_s1, %s1351_s27  ;;  %p1355_p1 = scmp.lt.u32.totalorder %s1351_s27, %s1684_s1 }
   0x8   :  { %p1357_p2 = pnand %p1355_p1, %p1352_p0 }
   0xa   :  { %1360 = shalt.err (!%p1357_p2)
}
   0xb   :  { %s1361_s8 = scalar_lea.vmem %s33_s22, 128  ;;  %p1366_p4 = scmp.lt.s32.totalorder %s33_s22, %s33_s22 }
   0xc   :  { %p1362_p3 = scmp.ne.s32.totalorder %s33_s22, %s1361_s8  ;;  %p1367_p5 = scmp.lt.s32.totalorder %s1361_s8, %s1361_s8 }
   0xe   :  { %p1368_p6 = por %p1367_p5, %p1366_p4 }
  0x10   :  { %p1369_p7 = pnand %p1368_p6, %p1362_p3 }
  0x12   :  { %1372 = shalt.err (!%p1369_p7)
}
  0x13   :  { %35 = dma.hbm_to_vmem [thread:$0]  %s1684_s1, 128, %s33_s22, [#allocation6]  }
  0x14   :  { %s1373_s13 = scalar_lea.hbm %s1683_s0, 128 }
  0x15   :  { %p1374_p8 = scmp.ne.s32.totalorder %s1683_s0, %s1373_s13  ;;  %p1377_p9 = scmp.lt.u32.totalorder %s1373_s13, %s1683_s0 }
  0x17   :  { %p1379_p10 = pnand %p1377_p9, %p1374_p8 }
  0x19   :  { %1382 = shalt.err (!%p1379_p10)
}
  0x1a   :  { %s1383_s18 = scalar_lea.vmem %s23_s24, 128  ;;  %p1388_p12 = scmp.lt.s32.totalorder %s23_s24, %s23_s24 }
  0x1b   :  { %p1384_p11 = scmp.ne.s32.totalorder %s23_s24, %s1383_s18  ;;  %p1389_p13 = scmp.lt.s32.totalorder %s1383_s18, %s1383_s18 }
  0x1d   :  { %p1390_p0 = por %p1389_p13, %p1388_p12 }
  0x1f   :  { %p1391_p1 = pnand %p1390_p0, %p1384_p11 }
  0x21   :  { %1394 = shalt.err (!%p1391_p1)
}
  0x22   :  { %25 = dma.hbm_to_vmem [thread:$0]  %s1683_s0, 128, %s23_s24, [#allocation3]  }
  0x23   :  { %s1471_s20 = smov [#allocation7]   ;;  %s1395_s25 = scalar_lea.hbm %s1685_s2, 5120 }
  0x24   :  { %s41_s21 = sshll.u32 %s1471_s20, 4  ;;  %p1396_p2 = scmp.ne.s32.totalorder %s1685_s2, %s1395_s25  ;;  %s42_s21 = int_to_ptr.vmem [resolvable:$true] %s41_s21 }
  0x25   :  { %p1399_p3 = scmp.lt.u32.totalorder %s1395_s25, %s1685_s2 }
  0x27   :  { %p1401_p4 = pnand %p1399_p3, %p1396_p2 }
  0x29   :  { %1404 = shalt.err (!%p1401_p4)
}
  0x2a   :  { %s1405_s30 = scalar_lea.vmem %s42_s21, 5120  ;;  %p1410_p6 = scmp.lt.s32.totalorder %s42_s21, %s42_s21 }
  0x2b   :  { %p1406_p5 = scmp.ne.s32.totalorder %s42_s21, %s1405_s30  ;;  %p1411_p7 = scmp.lt.s32.totalorder %s1405_s30, %s1405_s30 }
  0x2d   :  { %p1412_p8 = por %p1411_p7, %p1410_p6 }
  0x2f   :  { %p1413_p9 = pnand %p1412_p8, %p1406_p5 }
  0x31   :  { %1416 = shalt.err (!%p1413_p9)
}
  0x32   :  { %s1472_s0 = smov 64   ;;  %s1473_s24 = smov 4  }
  0x33   :  { %47 = dma.hbm_to_vmem [thread:$0]  %s1685_s2, 5120, %s42_s21, [#allocation6], %s1472_s0, %s1472_s0, %s1473_s24  }
  0x34   :  { %1461 = dma.done.wait [#allocation3], 128  }
  0x35   :  { %1462 = vsyncadd [#allocation3], 4294967168 }
  0x36   :  { %1463 = dma.done.wait [#allocation6], 5248  }
  0x37   :  { %1464 = vsyncadd [#allocation6], 4294962048  ;;  %v1474_v0 = vmov 0.0   ;;  %vm1475_vm0 = vmmov 0   ;;  %v1287_v1 = vld [vmem:[#allocation7] sm:$0xff]   ;;  %v1288_v2 = vld [vmem:[#allocation7 + $0x8] sm:$0xff]  }
  0x38   :  { %1162 = vmatprep.subr.bf16.mxu0 %v1474_v0  ;;  %1170 = vmatprep.mubr.msk.bf16.mxu0 %vm1475_vm0, %v1474_v0  ;;  %v1289_v3 = vld [vmem:[#allocation7 + $0x10] sm:$0xff]   ;;  %vm101_vm1 = vcmask 523264   ;;  %v1290_v4 = vld [vmem:[#allocation7 + $0x18] sm:$0xff]   ;;  %v1291_v7 = vld [vmem:[#allocation7 + $0x20] sm:$0xff]   ;;  %s1476_s14 = smov 8   ;;  %vm542_vm2 = vcmask 1043456  }
  0x39   :  { %1174 = vmatprep.subr.bf16.mxu1 %v1474_v0  ;;  %1182 = vmatprep.mubr.msk.bf16.mxu1 %vm1475_vm0, %v1474_v0  ;;  %v1559_v5 = vld [vmem:[#allocation2] sm:$0xff]  ;;  %v1292_v8 = vld [vmem:[#allocation7 + $0x28] sm:$0xff]   ;;  %v1294_v10 = vld [vmem:[#allocation7 + $0x38] sm:$0xff]   ;;  %s1477_s1 = smov 120   ;;  %vm526_vm3 = vcmask 64512   ;;  %s1479_s0 = smov [#allocation9]  }
  0x3a   :  { %1163 = vmatpush3.bf16.msra.mxu0 %v1287_v1  ;;  %v61_v6 = vpack.c.bf16 %v1559_v5, %v1559_v5  ;;  %1175 = vmatpush3.bf16.msra.mxu1 %v1291_v7  ;;  %v1293_v9 = vld [vmem:[#allocation7 + $0x30] sm:$0xff]   ;;  %v1049_v11 = vld [vmem:[%s1686_s3] ss:$0 sm:$0xff]  ;;  %v1295_v23 = vld [vmem:[#allocation7 + $0x40] sm:$0xff]   ;;  %s1031_s24 = sshll.u32 %s1479_s0, 4  ;;  %s1032_s24 = int_to_ptr.vmem [resolvable:$true] %s1031_s24 }
  0x3b   :  { %1164 = vmatprep.subr.bf16.mxu0 %v1474_v0  ;;  %1176 = vmatprep.subr.bf16.mxu1 %v1474_v0  ;;  %v1296_v24 = vld [vmem:[#allocation7 + $0x48] sm:$0xff]   ;;  %v1297_v25 = vld [vmem:[#allocation7 + $0x50] sm:$0xff]   ;;  %v1298_v26 = vld [vmem:[#allocation7 + $0x58] sm:$0xff]  }
  0x3c   :  { %v1056_v27 = vld [vmem:[%s1686_s3 + $0x1] ss:$0 sm:$0xff]  ;;  %v1299_v39 = vld [vmem:[#allocation7 + $0x60] sm:$0xff]   ;;  %v1300_v40 = vld [vmem:[#allocation7 + $0x68] sm:$0xff]  }
  0x3d   :  { %v1301_v41 = vld [vmem:[#allocation7 + $0x70] sm:$0xff]   ;;  %v1302_v42 = vld [vmem:[#allocation7 + $0x78] sm:$0xff]   ;;  %v1303_v55 = vld [vmem:[#allocation7 + $0x80] sm:$0xff]  }
  0x3e   :  { %1165 = vmatpush3.bf16.msra.mxu0 %v1288_v2  ;;  %1177 = vmatpush3.bf16.msra.mxu1 %v1292_v8  ;;  %v1063_v43 = vld [vmem:[%s1686_s3 + $0x2] ss:$0 sm:$0xff]  ;;  %v1304_v56 = vld [vmem:[#allocation7 + $0x88] sm:$0xff]   ;;  %v1305_v57 = vld [vmem:[#allocation7 + $0x90] sm:$0xff]  }
  0x3f   :  { %1166 = vmatprep.subr.bf16.mxu0 %v1474_v0  ;;  %1178 = vmatprep.subr.bf16.mxu1 %v1474_v0  ;;  %v1306_v58 = vld [vmem:[#allocation7 + $0x98] sm:$0xff]  }
  0x40   :  { %v515_v59 = vld [vmem:[#allocation5] sm:$0xff] }
  0x41   :  { %517 = vrot.lane.b32.xlu0 %v515_v59, %s1476_s14  ;;  %v1070_v60 = vld [vmem:[%s1686_s3 + $0x3] ss:$0 sm:$0xff] }
  0x42   :  { %1167 = vmatpush3.bf16.msra.mxu0 %v1289_v3  ;;  %1179 = vmatpush3.bf16.msra.mxu1 %v1293_v9 }
  0x43   :  { %1168 = vmatprep.subr.bf16.mxu0 %v1474_v0  ;;  %1180 = vmatprep.subr.bf16.mxu1 %v1474_v0 }
  0x46   :  { %1169 = vmatpush3.bf16.msra.mxu0 %v1290_v4  ;;  %1181 = vmatpush3.bf16.msra.mxu1 %v1294_v10  ;;  %v1077_v10 = vld [vmem:[%s1686_s3 + $0x4] ss:$0 sm:$0xff] }
  0x47   :  { %1186 = vmatprep.subr.bf16.mxu0 %v1474_v0  ;;  %1198 = vmatprep.subr.bf16.mxu1 %v1474_v0 }
  0x49   :  { %1171 = vmatmul.mubr.msk.bf16.vlgmr.msra.gmra.mrb[0].mxu0 %vm101_vm1, %v61_v6 }
  0x4a   :  { %1194 = vmatprep.mubr.msk.bf16.mxu0 %vm1475_vm0, %v1474_v0  ;;  %1187 = vmatpush3.bf16.msra.mxu0 %v1295_v23 }
  0x4b   :  { %1188 = vmatprep.subr.bf16.mxu0 %v1474_v0 }
  0x4e   :  { %1189 = vmatpush3.bf16.msra.mxu0 %v1296_v24 }
  0x4f   :  { %1190 = vmatprep.subr.bf16.mxu0 %v1474_v0 }
  0x52   :  { %1191 = vmatpush3.bf16.msra.mxu0 %v1297_v25 }
  0x53   :  { %1192 = vmatprep.subr.bf16.mxu0 %v1474_v0 }
  0x56   :  { %1193 = vmatpush3.bf16.msra.mxu0 %v1298_v26 }
  0x57   :  { %1210 = vmatprep.subr.bf16.mxu0 %v1474_v0 }
 0x11c   :  { %v139_v12 = vpop.f32.mrb[0].mxu0 }
 0x11d   :  { %v140_v13 = vadd.f32 %v1049_v11, %v139_v12  ;;  %v1172_v14 = vpop.f32.mrb[1].mxu0  ;;  %v530_v12 = vld [vmem:[#allocation7 + $0xa0] sm:$0xf] }
 0x11e   :  { %v142_v15 = vpop.f32.mrb[2].mxu0 }
 0x11f   :  { %v145_v16 = vmul.f32 0.5, %v140_v13  ;;  %v1173_v17 = vpop.f32.mrb[3].mxu0  ;;  %v544_v15 = vsel %vm542_vm2, %v530_v12, 0 }
 0x121   :  { %1323 = vtanh.f32 %v145_v16 }
 0x12b   :  { %v1324_v18 = vpop.eup %1323 }
 0x12c   :  { %v147_v19 = vadd.f32 1.0, %v1324_v18 }
 0x12e   :  { %v148_v20 = vmul.f32 0.5, %v147_v19 }
 0x130   :  { %v149_v21 = vmul.f32 %v148_v20, %v140_v13 }
 0x132   :  { %v150_v22 = vpack.c.bf16 %v149_v21, %v149_v21 }
 0x134   :  { %1183 = vmatmul.mubr.msk.bf16.vlgmr.msra.gmra.mrb[0].mxu1 %vm101_vm1, %v150_v22 }
 0x135   :  { %1206 = vmatprep.mubr.msk.bf16.mxu1 %vm1475_vm0, %v1474_v0  ;;  %1199 = vmatpush3.bf16.msra.mxu1 %v1299_v39 }
 0x136   :  { %1200 = vmatprep.subr.bf16.mxu1 %v1474_v0 }
 0x139   :  { %1201 = vmatpush3.bf16.msra.mxu1 %v1300_v40 }
 0x13a   :  { %1202 = vmatprep.subr.bf16.mxu1 %v1474_v0 }
 0x13d   :  { %1203 = vmatpush3.bf16.msra.mxu1 %v1301_v41 }
 0x13e   :  { %1204 = vmatprep.subr.bf16.mxu1 %v1474_v0 }
 0x141   :  { %1205 = vmatpush3.bf16.msra.mxu1 %v1302_v42 }
 0x142   :  { %1222 = vmatprep.subr.bf16.mxu1 %v1474_v0 }
 0x207   :  { %v229_v28 = vpop.f32.mrb[0].mxu1 }
 0x208   :  { %v230_v29 = vadd.f32 %v1056_v27, %v229_v28  ;;  %v1184_v30 = vpop.f32.mrb[1].mxu1  ;;  %v518_v28 = vpop.permute.xlu0 %517 }
 0x209   :  { %v232_v31 = vpop.f32.mrb[2].mxu1 }
 0x20a   :  { %v235_v32 = vmul.f32 0.5, %v230_v29  ;;  %v1185_v33 = vpop.f32.mrb[3].mxu1 }
 0x20c   :  { %1325 = vtanh.f32 %v235_v32 }
 0x216   :  { %v1326_v34 = vpop.eup %1325 }
 0x217   :  { %v237_v35 = vadd.f32 1.0, %v1326_v34 }
 0x219   :  { %v238_v36 = vmul.f32 0.5, %v237_v35 }
 0x21b   :  { %v239_v37 = vmul.f32 %v238_v36, %v230_v29 }
 0x21d   :  { %v240_v38 = vpack.c.bf16 %v239_v37, %v239_v37 }
 0x21f   :  { %1195 = vmatmul.mubr.msk.bf16.vlgmr.msra.gmra.mrb[4].mxu0 %vm101_vm1, %v240_v38 }
 0x220   :  { %1218 = vmatprep.mubr.msk.bf16.mxu0 %vm1475_vm0, %v1474_v0  ;;  %1211 = vmatpush3.bf16.msra.mxu0 %v1303_v55 }
 0x221   :  { %1212 = vmatprep.subr.bf16.mxu0 %v1474_v0 }
 0x224   :  { %1213 = vmatpush3.bf16.msra.mxu0 %v1304_v56 }
 0x225   :  { %1214 = vmatprep.subr.bf16.mxu0 %v1474_v0 }
 0x228   :  { %1215 = vmatpush3.bf16.msra.mxu0 %v1305_v57 }
 0x229   :  { %1216 = vmatprep.subr.bf16.mxu0 %v1474_v0 }
 0x22c   :  { %1217 = vmatpush3.bf16.msra.mxu0 %v1306_v58 }
 0x22d   :  { %1240 = vmatprep.subr.bf16.mxu0 %v1474_v0 }
 0x2f2   :  { %v319_v44 = vpop.f32.mrb[4].mxu0 }
 0x2f3   :  { %v320_v45 = vadd.f32 %v1063_v43, %v319_v44  ;;  %v1196_v46 = vpop.f32.mrb[5].mxu0  ;;  %v1307_v44 = vld [vmem:[#allocation7 + $0xc0] sm:$0xff]  }
 0x2f4   :  { %v322_v47 = vpop.f32.mrb[6].mxu0  ;;  %v1309_v46 = vld [vmem:[#allocation7 + $0xd0] sm:$0xff]  }
 0x2f5   :  { %v325_v48 = vmul.f32 0.5, %v320_v45  ;;  %v1197_v49 = vpop.f32.mrb[7].mxu0  ;;  %v1310_v47 = vld [vmem:[#allocation7 + $0xd8] sm:$0xff]  }
 0x2f7   :  { %1327 = vtanh.f32 %v325_v48  ;;  %v1084_v48 = vld [vmem:[%s1686_s3 + $0x5] ss:$0 sm:$0xff] }
 0x301   :  { %v1328_v50 = vpop.eup %1327 }
 0x302   :  { %v327_v51 = vadd.f32 1.0, %v1328_v50 }
 0x304   :  { %v328_v52 = vmul.f32 0.5, %v327_v51 }
 0x306   :  { %v329_v53 = vmul.f32 %v328_v52, %v320_v45  ;;  %v1308_v45 = vld [vmem:[#allocation7 + $0xc8] sm:$0xff]  }
 0x308   :  { %v330_v54 = vpack.c.bf16 %v329_v53, %v329_v53 }
 0x30a   :  { %1207 = vmatmul.mubr.msk.bf16.vlgmr.msra.gmra.mrb[4].mxu1 %vm101_vm1, %v330_v54 }
 0x30b   :  { %1224 = vmatprep.mubr.msk.bf16.mxu1 %vm1475_vm0, %v1474_v0  ;;  %1223 = vmatpush3.bf16.msra.mxu1 %v544_v15  ;;  %v1316_v15 = vld [vmem:[#allocation7 + $0x108] sm:$0xff]  }
 0x30c   :  { %1228 = vmatprep.subr.bf16.mxu1 %v1474_v0 }
 0x3dd   :  { %v409_v61 = vpop.f32.mrb[4].mxu1 }
 0x3de   :  { %v410_v62 = vadd.f32 %v1070_v60, %v409_v61  ;;  %v1208_v63 = vpop.f32.mrb[5].mxu1  ;;  %v1311_v60 = vld [vmem:[#allocation7 + $0xe0] sm:$0xff]   ;;  %v1312_v61 = vld [vmem:[#allocation7 + $0xe8] sm:$0xff]  }
 0x3df   :  { %v412_v1 = vpop.f32.mrb[6].mxu1  ;;  %v1314_v63 = vld [vmem:[#allocation7 + $0xf8] sm:$0xff]  }
 0x3e0   :  { %v415_v2 = vmul.f32 0.5, %v410_v62  ;;  %v1209_v3 = vpop.f32.mrb[7].mxu1  ;;  %v1087_v1 = vld [vmem:[%s1686_s3 + $0x6] ss:$0 sm:$0xff] }
 0x3e2   :  { %1329 = vtanh.f32 %v415_v2 }
 0x3ec   :  { %v1330_v4 = vpop.eup %1329 }
 0x3ed   :  { %v417_v6 = vadd.f32 1.0, %v1330_v4 }
 0x3ef   :  { %v418_v7 = vmul.f32 0.5, %v417_v6 }
 0x3f1   :  { %v419_v8 = vmul.f32 %v418_v7, %v410_v62  ;;  %v1313_v62 = vld [vmem:[#allocation7 + $0xf0] sm:$0xff]  }
 0x3f3   :  { %v420_v9 = vpack.c.bf16 %v419_v8, %v419_v8 }
 0x3f5   :  { %1219 = vmatmul.mubr.msk.bf16.vlgmr.msra.gmra.mrb[8].mxu0 %vm101_vm1, %v420_v9 }
 0x3f6   :  { %1248 = vmatprep.mubr.msk.bf16.mxu0 %vm1475_vm0, %v1474_v0  ;;  %1241 = vmatpush3.bf16.msra.mxu0 %v1311_v60 }
 0x3f7   :  { %1242 = vmatprep.subr.bf16.mxu0 %v1474_v0 }
 0x3fa   :  { %1243 = vmatpush3.bf16.msra.mxu0 %v1312_v61 }
 0x3fb   :  { %1244 = vmatprep.subr.bf16.mxu0 %v1474_v0 }
 0x3fe   :  { %1245 = vmatpush3.bf16.msra.mxu0 %v1313_v62 }
 0x3ff   :  { %1246 = vmatprep.subr.bf16.mxu0 %v1474_v0 }
 0x402   :  { %1247 = vmatpush3.bf16.msra.mxu0 %v1314_v63 }
 0x403   :  { %1264 = vmatprep.subr.bf16.mxu0 %v1474_v0 }
 0x4c8   :  { %v499_v11 = vpop.f32.mrb[8].mxu0 }
 0x4c9   :  { %v500_v13 = vadd.f32 %v1077_v10, %v499_v11  ;;  %v1220_v14 = vpop.f32.mrb[9].mxu0 }
 0x4ca   :  { %v502_v16 = vpop.f32.mrb[10].mxu0  ;;  %v1315_v14 = vld [vmem:[#allocation7 + $0x100] sm:$0xff]  }
 0x4cb   :  { %v506_v17 = vand.u32 2147483647, %v500_v13  ;;  %v1221_v18 = vpop.f32.mrb[11].mxu0  ;;  %v980_v19 = vmul.f32 %v500_v13, %v500_v13  ;;  %v505_v25 = vmax.f32 %v500_v13, 0.0  ;;  %v1317_v16 = vld [vmem:[#allocation7 + $0x110] sm:$0xff]  }
 0x4cc   :  { %v1094_v18 = vld [vmem:[%s1686_s3 + $0x7] ss:$0 sm:$0xff] }
 0x4cd   :  { %v507_v20 = vsub.f32 0.0, %v506_v17  ;;  %982 = vrot.lane.b32.xlu1 %v980_v19, %s1476_s14  ;;  %v1318_v17 = vld [vmem:[#allocation7 + $0x118] sm:$0xff]  }
 0x4cf   :  { %v508_v21 = vmul.f32 1.442695, %v507_v20 }
 0x4d1   :  { %1331 = vpow2.f32 %v508_v21 }
 0x4db   :  { %v1332_v22 = vpop.eup %1331 }
 0x4dc   :  { %v510_v23 = vadd.f32 1.0, %v1332_v22 }
 0x4de   :  { %1333 = vlog2.f32 %v510_v23 }
 0x4e8   :  { %v1334_v24 = vpop.eup %1333 }
 0x4e9   :  { %v512_v26 = vmul.f32 0.6931472, %v1334_v24 }
 0x4eb   :  { %v513_v27 = vadd.f32 %v512_v26, %v505_v25 }
 0x4ed   :  { %v514_v29 = vadd.f32 1e-08, %v513_v27 }
 0x4ef   :  { %v520_v30 = vmul.f32 %v518_v28, %v514_v29  ;;  %1335 = vlog2.f32 %v514_v29  ;;  %v979_v31 = vmul.f32 %v514_v29, %v514_v29 }
 0x4f1   :  { %522 = vrot.lane.b32.xlu0 %v520_v30, %s1477_s1  ;;  %v1319_v30 = vld [vmem:[#allocation7 + $0x120] sm:$0xff]  }
 0x4f9   :  { %v1336_v34 = vpop.eup %1335 }
 0x4fa   :  { %v989_v37 = vmul.f32 0.6931472, %v1336_v34  ;;  %v1101_v34 = vld [vmem:[%s1686_s3 + $0x8] ss:$0 sm:$0xff] }
 0x53f   :  { %v983_v32 = vpop.permute.xlu1 %982 }
 0x540   :  { %v985_v33 = vadd.f32 %v983_v32, %v979_v31  ;;  %v1320_v31 = vld [vmem:[#allocation7 + $0x128] sm:$0xff]   ;;  %v1321_v32 = vld [vmem:[#allocation7 + $0x130] sm:$0xff]  }
 0x542   :  { %v1114_v35 = vadd.f32 -1.0, %v985_v33  ;;  %v1322_v33 = vld [vmem:[#allocation7 + $0x138] sm:$0xff]  }
 0x544   :  { %v987_v36 = vmul.f32 0.5, %v1114_v35 }
 0x546   :  { %v990_v38 = vsub.f32 %v987_v36, %v989_v37 }
 0x548   :  { %992 = vrot.lane.b32.xlu1 %v990_v38, %s1477_s1 }
 0x563   :  { %v523_v39 = vpop.permute.xlu0 %522 }
 0x564   :  { %v525_v40 = vadd.f32 %v523_v39, %v500_v13 }
 0x566   :  { %v528_v41 = vpack.c.bf16 %v525_v40, %v525_v40  ;;  %527 = vst.msk [vmem:[#allocation9] sm:$0xff] %vm526_vm3, %v525_v40 }
 0x568   :  { %1225 = vmatmul.mubr.msk.bf16.vlgmr.msra.gmra.mrb[8].mxu1 %vm526_vm3, %v528_v41 }
 0x569   :  { %1236 = vmatprep.mubr.msk.bf16.mxu1 %vm1475_vm0, %v1474_v0  ;;  %1229 = vmatpush3.bf16.msra.mxu1 %v1307_v44 }
 0x56a   :  { %1230 = vmatprep.subr.bf16.mxu1 %v1474_v0 }
 0x56d   :  { %1231 = vmatpush3.bf16.msra.mxu1 %v1308_v45 }
 0x56e   :  { %1232 = vmatprep.subr.bf16.mxu1 %v1474_v0 }
 0x571   :  { %1233 = vmatpush3.bf16.msra.mxu1 %v1309_v46 }
 0x572   :  { %1234 = vmatprep.subr.bf16.mxu1 %v1474_v0 }
 0x575   :  { %1235 = vmatpush3.bf16.msra.mxu1 %v1310_v47 }
 0x576   :  { %1252 = vmatprep.subr.bf16.mxu1 %v1474_v0 }
 0x5ba   :  { %v993_v42 = vpop.permute.xlu1 %992 }
 0x5bb   :  { %v995_v43 = vsel %vm526_vm3, %v993_v42, 0.0 }
 0x5bc   :  { %996 = vadd.xlane.f32.xlu1 %v995_v43 }
 0x63b   :  { %v580_v49 = vpop.f32.mrb[8].mxu1 }
 0x63c   :  { %v581_v50 = vadd.f32 %v1084_v48, %v580_v49  ;;  %v1226_v51 = vpop.f32.mrb[9].mxu1 }
 0x63d   :  { %v583_v52 = vpop.f32.mrb[10].mxu1 }
 0x63e   :  { %v586_v53 = vmul.f32 0.5, %v581_v50  ;;  %v1227_v54 = vpop.f32.mrb[11].mxu1 }
 0x640   :  { %1337 = vtanh.f32 %v586_v53 }
 0x64a   :  { %v1338_v55 = vpop.eup %1337 }
 0x64b   :  { %v588_v56 = vadd.f32 1.0, %v1338_v55 }
 0x64d   :  { %v589_v57 = vmul.f32 0.5, %v588_v56 }
 0x64f   :  { %v590_v58 = vmul.f32 %v589_v57, %v581_v50 }
 0x651   :  { %v591_v59 = vpack.c.bf16 %v590_v58, %v590_v58 }
 0x653   :  { %1237 = vmatmul.mubr.msk.bf16.vlgmr.msra.gmra.mrb[12].mxu1 %vm101_vm1, %v591_v59  ;;  %v959_v59 = vadd.f32 0.5, %v1559_v5 }
 0x654   :  { %1260 = vmatprep.mubr.msk.bf16.mxu1 %vm1475_vm0, %v1474_v0  ;;  %1253 = vmatpush3.bf16.msra.mxu1 %v1315_v14 }
 0x655   :  { %1254 = vmatprep.subr.bf16.mxu1 %v1474_v0  ;;  %v964_v63 = vsub.f32 1.0, %v959_v59 }
 0x658   :  { %1255 = vmatpush3.bf16.msra.mxu1 %v1316_v15 }
 0x659   :  { %1256 = vmatprep.subr.bf16.mxu1 %v1474_v0 }
 0x65c   :  { %1257 = vmatpush3.bf16.msra.mxu1 %v1317_v16 }
 0x65d   :  { %1258 = vmatprep.subr.bf16.mxu1 %v1474_v0 }
 0x660   :  { %1259 = vmatpush3.bf16.msra.mxu1 %v1318_v17 }
 0x726   :  { %v670_v2 = vpop.f32.mrb[12].mxu1 }
 0x727   :  { %v671_v3 = vadd.f32 %v1087_v1, %v670_v2  ;;  %v1238_v4 = vpop.f32.mrb[13].mxu1 }
 0x728   :  { %v673_v6 = vpop.f32.mrb[14].mxu1 }
 0x729   :  { %v676_v7 = vmul.f32 0.5, %v671_v3  ;;  %v1239_v8 = vpop.f32.mrb[15].mxu1 }
 0x72b   :  { %1339 = vtanh.f32 %v676_v7 }
 0x735   :  { %v1340_v9 = vpop.eup %1339 }
 0x736   :  { %v678_v10 = vadd.f32 1.0, %v1340_v9 }
 0x738   :  { %v679_v11 = vmul.f32 0.5, %v678_v10 }
 0x73a   :  { %v680_v12 = vmul.f32 %v679_v11, %v671_v3 }
 0x73c   :  { %v681_v13 = vpack.c.bf16 %v680_v12, %v680_v12 }
 0x73e   :  { %1249 = vmatmul.mubr.msk.bf16.vlgmr.msra.gmra.mrb[12].mxu0 %vm101_vm1, %v681_v13 }
 0x73f   :  { %1272 = vmatprep.mubr.msk.bf16.mxu0 %vm1475_vm0, %v1474_v0  ;;  %1265 = vmatpush3.bf16.msra.mxu0 %v1319_v30 }
 0x740   :  { %1266 = vmatprep.subr.bf16.mxu0 %v1474_v0 }
 0x743   :  { %1267 = vmatpush3.bf16.msra.mxu0 %v1320_v31 }
 0x744   :  { %1268 = vmatprep.subr.bf16.mxu0 %v1474_v0 }
 0x747   :  { %1269 = vmatpush3.bf16.msra.mxu0 %v1321_v32 }
 0x748   :  { %1270 = vmatprep.subr.bf16.mxu0 %v1474_v0  ;;  %v1108_v0 = vld [vmem:[%s1686_s3 + $0x9] ss:$0 sm:$0xff]  ;;  %s1478_s3 = smov [#allocation8]  }
 0x749   :  { %s1021_s30 = sshll.u32 %s1478_s3, 4  ;;  %s1022_s30 = int_to_ptr.vmem [resolvable:$true] %s1021_s30 }
 0x74a   :  { %s1417_s7 = scalar_lea.vmem %s1022_s30, 128  ;;  %p1422_p11 = scmp.lt.s32.totalorder %s1022_s30, %s1022_s30 }
 0x74b   :  { %1271 = vmatpush3.bf16.msra.mxu0 %v1322_v33  ;;  %p1418_p10 = scmp.ne.s32.totalorder %s1022_s30, %s1417_s7  ;;  %p1423_p12 = scmp.lt.s32.totalorder %s1417_s7, %s1417_s7 }
 0x74d   :  { %p1424_p13 = por %p1423_p12, %p1422_p11 }
 0x74f   :  { %p1425_p0 = pnand %p1424_p13, %p1418_p10 }
 0x811   :  { %v760_v19 = vpop.f32.mrb[12].mxu0 }
 0x812   :  { %v761_v20 = vadd.f32 %v1094_v18, %v760_v19  ;;  %v1250_v21 = vpop.f32.mrb[13].mxu0 }
 0x813   :  { %v763_v22 = vpop.f32.mrb[14].mxu0 }
 0x814   :  { %v766_v23 = vmul.f32 0.5, %v761_v20  ;;  %v1251_v24 = vpop.f32.mrb[15].mxu0 }
 0x816   :  { %1341 = vtanh.f32 %v766_v23 }
 0x820   :  { %v1342_v25 = vpop.eup %1341 }
 0x821   :  { %v768_v26 = vadd.f32 1.0, %v1342_v25 }
 0x823   :  { %v769_v27 = vmul.f32 0.5, %v768_v26 }
 0x825   :  { %v770_v28 = vmul.f32 %v769_v27, %v761_v20 }
 0x827   :  { %v771_v29 = vpack.c.bf16 %v770_v28, %v770_v28 }
 0x829   :  { %1261 = vmatmul.mubr.msk.bf16.vlgmr.msra.gmra.mrb[16].mxu1 %vm101_vm1, %v771_v29 }
 0x8fc   :  { %v850_v35 = vpop.f32.mrb[16].mxu1 }
 0x8fd   :  { %v851_v36 = vadd.f32 %v1101_v34, %v850_v35  ;;  %v1262_v37 = vpop.f32.mrb[17].mxu1 }
 0x8fe   :  { %v853_v38 = vpop.f32.mrb[18].mxu1 }
 0x8ff   :  { %v856_v39 = vmul.f32 0.5, %v851_v36  ;;  %v1263_v40 = vpop.f32.mrb[19].mxu1 }
 0x901   :  { %1343 = vtanh.f32 %v856_v39 }
 0x90b   :  { %v1344_v41 = vpop.eup %1343 }
 0x90c   :  { %v858_v42 = vadd.f32 1.0, %v1344_v41 }
 0x90e   :  { %v859_v43 = vmul.f32 0.5, %v858_v42 }
 0x910   :  { %v860_v44 = vmul.f32 %v859_v43, %v851_v36 }
 0x912   :  { %v861_v45 = vpack.c.bf16 %v860_v44, %v860_v44 }
 0x914   :  { %1273 = vmatmul.mubr.msk.bf16.vlgmr.msra.gmra.mrb[16].mxu0 %vm101_vm1, %v861_v45 }
 0x9e7   :  { %v940_v46 = vpop.f32.mrb[16].mxu0 }
 0x9e8   :  { %v941_v47 = vadd.f32 %v1108_v0, %v940_v46  ;;  %v1274_v48 = vpop.f32.mrb[17].mxu0 }
 0x9e9   :  { %v943_v49 = vpop.f32.mrb[18].mxu0 }
 0x9ea   :  { %v947_v50 = vand.u32 2147483647, %v941_v47  ;;  %v1275_v51 = vpop.f32.mrb[19].mxu0  ;;  %v946_v57 = vmax.f32 %v941_v47, 0.0 }
 0x9ec   :  { %v948_v52 = vsub.f32 0.0, %v947_v50 }
 0x9ee   :  { %v949_v53 = vmul.f32 1.442695, %v948_v52 }
 0x9f0   :  { %1345 = vpow2.f32 %v949_v53 }
 0x9fa   :  { %v1346_v54 = vpop.eup %1345 }
 0x9fb   :  { %v951_v55 = vadd.f32 1.0, %v1346_v54 }
 0x9fd   :  { %1347 = vlog2.f32 %v951_v55 }
 0xa07   :  { %v1348_v56 = vpop.eup %1347 }
 0xa08   :  { %v953_v58 = vmul.f32 0.6931472, %v1348_v56 }
 0xa0a   :  { %v954_v60 = vadd.f32 %v953_v58, %v946_v57 }
 0xa0c   :  { %v955_v61 = vsub.f32 %v941_v47, %v954_v60  ;;  %v961_v62 = vsub.f32 0.0, %v954_v60 }
 0xa0e   :  { %v956_v1 = vmul.f32 1.442695, %v955_v61  ;;  %v960_v2 = vmax.f32 %v955_v61, -100.0  ;;  %v962_v3 = vmax.f32 %v961_v62, -100.0 }
 0xa10   :  { %1349 = vpow2.f32 %v956_v1  ;;  %v963_v4 = vmul.f32 %v960_v2, %v959_v59  ;;  %v965_v6 = vmul.f32 %v964_v63, %v962_v3 }
 0xa12   :  { %v966_v7 = vadd.f32 %v965_v6, %v963_v4 }
 0xa14   :  { %v967_v8 = vsub.f32 0.0, %v966_v7 }
 0xa16   :  { %v968_v9 = vsel %vm101_vm1, %v967_v8, 0.0 }
 0xa17   :  { %969 = vadd.xlane.f32.xlu0 %v968_v9 }
 0xa1a   :  { %v1350_v10 = vpop.eup %1349 }
 0xa1b   :  { %958 = vst.msk [vmem:[#allocation8] sm:$0xff] %vm101_vm1, %v1350_v10 }
 0xa1c   :  { %1428 = shalt.err (!%p1425_p0)
}
 0xa1d   :  { %s1429_s9 = scalar_lea.hbm %s1687_s4, 128 }
 0xa1e   :  { %p1430_p1 = scmp.ne.s32.totalorder %s1687_s4, %s1429_s9  ;;  %p1433_p2 = scmp.lt.u32.totalorder %s1429_s9, %s1687_s4 }
 0xa20   :  { %p1435_p3 = pnand %p1433_p2, %p1430_p1 }
 0xa22   :  { %1438 = shalt.err (!%p1435_p3)
}
 0xa23   :  { %1024 = dma.vmem_to_hbm [thread:$0]  %s1022_s30, 128, %s1687_s4, [#allocation4]  }
 0xa24   :  { %s1439_s16 = scalar_lea.vmem %s1032_s24, 128  ;;  %p1444_p5 = scmp.lt.s32.totalorder %s1032_s24, %s1032_s24 }
 0xa25   :  { %p1440_p4 = scmp.ne.s32.totalorder %s1032_s24, %s1439_s16  ;;  %p1445_p6 = scmp.lt.s32.totalorder %s1439_s16, %s1439_s16 }
 0xa27   :  { %p1446_p7 = por %p1445_p6, %p1444_p5 }
 0xa29   :  { %p1447_p8 = pnand %p1446_p7, %p1440_p4 }
 0xa2b   :  { %1450 = shalt.err (!%p1447_p8)
}
 0xa2c   :  { %s1451_s1 = scalar_lea.hbm %s1688_s5, 128 }
 0xa2d   :  { %p1452_p9 = scmp.ne.s32.totalorder %s1688_s5, %s1451_s1  ;;  %p1455_p10 = scmp.lt.u32.totalorder %s1451_s1, %s1688_s5 }
 0xa2f   :  { %p1457_p11 = pnand %p1455_p10, %p1452_p9 }
 0xa31   :  { %1460 = shalt.err (!%p1457_p11)
}
 0xa32   :  { %1034 = dma.vmem_to_hbm [thread:$0]  %s1032_s24, 128, %s1688_s5, [#allocation10]   ;;  %v997_v5 = vpop.xlane.xlu1 %996  ;;  %v1006_v18 = vlaneseq }
 0xa33   :  { %v998_v11 = vrot.slane %v997_v5, 4 }
 0xa34   :  { %v1007_v22 = vand.u32 127, %v1006_v18 }
 0xa35   :  { %v999_v12 = vadd.f32 %v998_v11, %v997_v5 }
 0xa36   :  { %vm1010_vm4 = vcmp.eq.s32.totalorder %v1007_v22, 2  ;;  %vm1009_vm5 = vcmp.eq.s32.totalorder %v1007_v22, 1  ;;  %vm1008_vm6 = vcmp.eq.s32.totalorder %v1007_v22, 0 }
 0xa37   :  { %v1000_v13 = vrot.slane %v999_v12, 2 }
 0xa39   :  { %v1001_v14 = vadd.f32 %v1000_v13, %v999_v12 }
 0xa3b   :  { %v1002_v17 = vrot.slane %v1001_v14, 1 }
 0xa3d   :  { %v1003_v21 = vadd.f32 %v1002_v17, %v1001_v14 }
 0xa3f   :  { %v1004_v25 = vmul.f32 0.125, %v1003_v21 }
 0xa41   :  { %v1011_v28 = vsel %vm1010_vm4, %v1004_v25, 0.0 }
 0xaa4   :  { %v970_v15 = vpop.xlane.xlu0 %969 }
 0xaa5   :  { %v971_v16 = vrot.slane %v970_v15, 4 }
 0xaa7   :  { %v972_v19 = vadd.f32 %v971_v16, %v970_v15 }
 0xaa9   :  { %v973_v20 = vrot.slane %v972_v19, 2 }
 0xaab   :  { %v974_v23 = vadd.f32 %v973_v20, %v972_v19 }
 0xaad   :  { %v975_v24 = vrot.slane %v974_v23, 1 }
 0xaaf   :  { %v976_v26 = vadd.f32 %v975_v24, %v974_v23 }
 0xab1   :  { %v978_v27 = vmul.f32 0.125, %v976_v26 }
 0xab3   :  { %v1005_v29 = vadd.f32 %v1004_v25, %v978_v27  ;;  %v1012_v30 = vsel %vm1009_vm5, %v978_v27, %v1011_v28 }
 0xab5   :  { %v1013_v31 = vsel %vm1008_vm6, %v1005_v29, %v1012_v30 }
 0xab6   :  { %1014 = vst [vmem:[%s1689_s6] sm:$0x1] %v1013_v31 }
 0xab7   :  { %1465 = dma.done.wait [#allocation4], 128  }
 0xab8   :  { %1466 = vsyncadd [#allocation4], 4294967168 }
 0xab9   :  { %1467 = dma.done.wait [#allocation10], 128  }
 0xaba   :  { %1468 = vsyncadd [#allocation10], 4294967168 }
 0xabb   :  { %1045 = vsyncpa [#allocation3], 1 }
 0xabc   :  { %1046 = vsyncpa [#allocation6], 1 }
 0xabd   :  { %1047 = vsyncpa [#allocation4], 1 }
 0xabe   :  { %1048 = vsyncpa [#allocation10], 1 }

</bundles_post_ra>
